<compile_context>
chip_gen: v5e
topology: v5e:2x2
jax: 0.10.0
libtpu: 0.0.40
codegen_flags: <defaults>
</compile_context>

<pallas_src>
import functools
import math

import jax
import jax.numpy as jnp
from jax.experimental import pallas as pl
from jax.experimental.pallas import tpu as pltpu


# --------------------------------------------------------------------------
# Helpers
# --------------------------------------------------------------------------
@functools.lru_cache(maxsize=None)
def _vmem_limit_bytes():
    """~75% of physical VMEM: ~96 MiB on v5e/v6e (128), ~48 MiB on v7x (64)."""
    cap = 128 * 1024 * 1024
    try:
        cap = int(pltpu.get_tpu_info().vmem_capacity_bytes)
    except Exception:
        pass
    return (cap * 3) // 4


def _const_spec(shape, index_map):
    """Grid-invariant operand: single-buffered (halves weight VMEM residency)."""
    try:
        return pl.BlockSpec(shape, index_map, pipeline_mode=pl.Buffered(1))
    except TypeError:   # older Pallas without pipeline_mode
        return pl.BlockSpec(shape, index_map)


def _seq_tile(n, cap=256):
    """Largest multiple of 16 <= cap that divides n, else n (full-dim block).
    Multiples of 16 keep bf16 (16,128) and f32 (8,128) tiling both happy."""
    c = min(cap, n)
    c -= c % 16
    while c >= 16:
        if n % c == 0:
            return c
        c -= 16
    return n


def _round_up(x, m):
    return ((x + m - 1) // m) * m


def rope_cos_diag(context_len, head_dim):
    """diag(R[l]) for the block-diagonal 2x2 rotary matrices: repeat(cos, 2)."""
    i = jnp.arange(head_dim // 2, dtype=jnp.float32)
    theta = 10000.0 ** (-2.0 * i / head_dim)
    pos = jnp.arange(context_len, dtype=jnp.float32)[:, None]
    cos = jnp.cos(pos * theta[None, :])                       # (L, d/2)
    return jnp.repeat(cos, 2, axis=-1)                        # (L, d)


# --------------------------------------------------------------------------
# Kernel 1: RMSNorm (shared across heads via scratch) -> per-head Q/K/V
#           projections -> diagonal-RoPE (+ 1/sqrt(d) on q).
# Grid: (B, T-tiles, H); outputs written directly in (B, H, T, d) layout.
# --------------------------------------------------------------------------
def qkv_kernel(x_ref, g_ref, wq_ref, wk_ref, wv_ref, cos_ref,
               q_ref, k_ref, v_ref, xn_ref, *, inv_sqrt_d, eps=1e-6):
    @pl.when(pl.program_id(2) == 0)               # heads are innermost ('arbitrary')
    def _():
        x = x_ref[0]                              # (tt, E) f32
        ms = jnp.mean(x * x, axis=-1, keepdims=True)
        xn_ref[...] = x * jax.lax.rsqrt(ms + eps) * g_ref[...]

    xn = xn_ref[...].astype(jnp.bfloat16)         # bf16 MXU operand, f32 math above
    cos = cos_ref[...]                            # (tt, d) f32
    q = jnp.dot(xn, wq_ref[0], preferred_element_type=jnp.float32)
    k = jnp.dot(xn, wk_ref[0], preferred_element_type=jnp.float32)
    v = jnp.dot(xn, wv_ref[0], preferred_element_type=jnp.float32)
    q_ref[0, 0] = (q * cos * inv_sqrt_d).astype(jnp.bfloat16)   # scale folded in q
    k_ref[0, 0] = (k * cos).astype(jnp.bfloat16)
    v_ref[0, 0] = v.astype(jnp.bfloat16)


def qkv_forward(x, g, wq, wk, wv, cos, inv_sqrt_d, tt, vmem_limit):
    B, T, E = x.shape
    H, _, d = wq.shape
    n_t = T // tt
    qkv_out_spec = pl.BlockSpec((1, 1, tt, d), lambda b, t, h: (b, h, t, 0))
    w_spec = pl.BlockSpec((1, E, d), lambda b, t, h: (h, 0, 0))
    return pl.pallas_call(
        functools.partial(qkv_kernel, inv_sqrt_d=inv_sqrt_d),
        out_shape=tuple(jax.ShapeDtypeStruct((B, H, T, d), jnp.bfloat16)
                        for _ in range(3)),
        grid=(B, n_t, H),
        in_specs=[
            pl.BlockSpec((1, tt, E), lambda b, t, h: (b, t, 0)),   # x
            _const_spec((1, E), lambda b, t, h: (0, 0)),           # rms scale
            w_spec, w_spec, w_spec,                                # per-head W_{q,k,v}
            pl.BlockSpec((tt, d), lambda b, t, h: (t, 0)),         # cos table
        ],
        out_specs=(qkv_out_spec, qkv_out_spec, qkv_out_spec),
        scratch_shapes=[pltpu.VMEM((tt, E), jnp.float32)],
        compiler_params=pltpu.CompilerParams(
            dimension_semantics=("parallel", "parallel", "arbitrary"),
            vmem_limit_bytes=vmem_limit),
    )(x, g, wq, wk, wv, cos)


# --------------------------------------------------------------------------
# Kernel 2: causal softmax attention.  Grid = (B*H, q-tiles), both 'parallel'.
# --------------------------------------------------------------------------
def attn_kernel(q_ref, k_ref, v_ref, o_ref, *, causal):
    q = q_ref[0]                                   # (tq, d) bf16, already scaled
    k = k_ref[0]                                   # (T, d)  bf16
    v = v_ref[0]                                   # (T, d)  bf16
    s = jnp.einsum('qd,kd->qk', q, k, preferred_element_type=jnp.float32)
    tq, T = s.shape
    if causal:
        q0 = pl.program_id(1) * tq
        rows = q0 + jax.lax.broadcasted_iota(jnp.int32, (tq, T), 0)
        cols = jax.lax.broadcasted_iota(jnp.int32, (tq, T), 1)
        s = jnp.where(cols > rows, jnp.float32(-jnp.inf), s)
    m = jnp.max(s, axis=-1, keepdims=True)
    e = jnp.exp(s - m)
    p = e / jnp.sum(e, axis=-1, keepdims=True)     # exact div for reference parity
    o_ref[0] = jnp.einsum('qk,kd->qd', p.astype(jnp.bfloat16), v,
                          preferred_element_type=jnp.float32)


def attention_forward(q, k, v, causal, tq, vmem_limit):
    BH, T, d = q.shape
    return pl.pallas_call(
        functools.partial(attn_kernel, causal=causal),
        out_shape=jax.ShapeDtypeStruct((BH, T, d), jnp.float32),
        grid=(BH, T // tq),
        in_specs=[
            pl.BlockSpec((1, tq, d), lambda bh, qi: (bh, qi, 0)),
            pl.BlockSpec((1, T, d), lambda bh, qi: (bh, 0, 0)),
            pl.BlockSpec((1, T, d), lambda bh, qi: (bh, 0, 0)),
        ],
        out_specs=pl.BlockSpec((1, tq, d), lambda bh, qi: (bh, qi, 0)),
        compiler_params=pltpu.CompilerParams(
            dimension_semantics=("parallel", "parallel"),
            vmem_limit_bytes=vmem_limit),
    )(q, k, v)


# --------------------------------------------------------------------------
# Kernel 3: residual -> RMSNorm -> fc1 -> SwiGLU -> fc2 -> residual.
# Rows = B*T (padded to the row tile), weights single-buffered, beta in SMEM.
# --------------------------------------------------------------------------
def ffn_kernel(x_ref, a_ref, g_ref, w1_ref, b1_ref, wg_ref, bg_ref,
               wl_ref, bl_ref, beta_ref, w2_ref, b2_ref, o_ref, *, eps=1e-6):
    x1 = x_ref[...] + a_ref[...]                   # first residual (f32)
    ms = jnp.mean(x1 * x1, axis=-1, keepdims=True)
    xn = (x1 * jax.lax.rsqrt(ms + eps) * g_ref[...]).astype(jnp.bfloat16)
    h1 = jnp.dot(xn, w1_ref[...], preferred_element_type=jnp.float32) + b1_ref[...]
    h1b = h1.astype(jnp.bfloat16)
    gate = jnp.dot(h1b, wg_ref[...], preferred_element_type=jnp.float32) + bg_ref[...]
    lin = jnp.dot(h1b, wl_ref[...], preferred_element_type=jnp.float32) + bl_ref[...]
    beta = beta_ref[0, 0]                          # scalar from SMEM
    swish = gate * jax.nn.sigmoid(beta * gate)     # f32 elementwise
    y = jnp.dot((swish * lin).astype(jnp.bfloat16), w2_ref[...],
                preferred_element_type=jnp.float32) + b2_ref[...]
    o_ref[...] = y + x1                            # second residual


def ffn_forward(x2, attn2, g, w1, b1, wg, bg, wl, bl, beta, w2, b2, vmem_limit):
    R, E = x2.shape
    S = w1.shape[1]
    # cdiv-style grid: pad rows instead of falling back to one giant block.
    tr = min(512, max(8, (R // 2) - ((R // 2) % 8))) if R >= 16 else max(8, R)
    tr = max(8, tr - (tr % 8))
    R_pad = _round_up(R, tr)
    if R_pad != R:
        pad = ((0, R_pad - R), (0, 0))
        x2 = jnp.pad(x2, pad)
        attn2 = jnp.pad(attn2, pad)
    rows = pl.BlockSpec((tr, E), lambda i: (i, 0))
    out = pl.pallas_call(
        ffn_kernel,
        out_shape=jax.ShapeDtypeStruct((R_pad, E), jnp.float32),
        grid=(R_pad // tr,),
        in_specs=[
            rows, rows,                                        # x, attn
            _const_spec((1, E), lambda i: (0, 0)),             # rms scale
            _const_spec((E, S), lambda i: (0, 0)),             # fc1 W  (bf16)
            _const_spec((1, S), lambda i: (0, 0)),             # fc1 b
            _const_spec((S, S), lambda i: (0, 0)),             # gate W (bf16)
            _const_spec((1, S), lambda i: (0, 0)),             # gate b
            _const_spec((S, S), lambda i: (0, 0)),             # lin W  (bf16)
            _const_spec((1, S), lambda i: (0, 0)),             # lin b
            pl.BlockSpec(memory_space=pltpu.MemorySpace.SMEM), # beta scalar
            _const_spec((S, E), lambda i: (0, 0)),             # fc2 W  (bf16)
            _const_spec((1, E), lambda i: (0, 0)),             # fc2 b
        ],
        out_specs=rows,
        compiler_params=pltpu.CompilerParams(
            dimension_semantics=("parallel",),
            vmem_limit_bytes=vmem_limit),
    )(x2, attn2, g, w1, b1, wg, bg, wl, bl, beta, w2, b2)
    return out[:R]


# --------------------------------------------------------------------------
# Full block forward.
# --------------------------------------------------------------------------
def llama_block_forward(x, p, *, context_len, n_heads, causal):
    B, T, E = x.shape
    H = n_heads
    assert E % H == 0 and T <= context_len
    d = E // H
    vmem = _vmem_limit_bytes()

    cos = rope_cos_diag(context_len, d)[:T]        # (T, d), shared by all heads
    inv_sqrt_d = 1.0 / math.sqrt(d)

    tt = _seq_tile(T)
    q, k, v = qkv_forward(x, p['rms_g'], p['wq'], p['wk'], p['wv'], cos,
                          inv_sqrt_d, tt, vmem)    # each (B, H, T, d) bf16

    BH = B * H
    tq = _seq_tile(T)
    attn = attention_forward(q.reshape(BH, T, d), k.reshape(BH, T, d),
                             v.reshape(BH, T, d), causal, tq, vmem)

    # Head merge: the single remaining XLA layout pass (q/k/v splits were
    # folded into kernel-1's weight layout / BlockSpec index maps).
    attn2 = attn.reshape(B, H, T, d).transpose(0, 2, 1, 3).reshape(B * T, E)
    x2 = x.reshape(B * T, E)

    y2 = ffn_forward(x2, attn2, p['rms_g'], p['w1'], p['b1'], p['wg'], p['bg'],
                     p['wl'], p['bl'], p['beta'], p['w2'], p['b2'], vmem)
    return y2.reshape(B, T, E)


# --------------------------------------------------------------------------
# Parameters (weights stored bf16, pre-transposed to (in, out); Q/K/V split
# per head as (H, E, d) so the head split is free in the kernel).
# --------------------------------------------------------------------------
def init_block_params(key, E, H, swiglu_mult):
    d = E // H
    S = int(swiglu_mult * E)
    ks = jax.random.split(key, 7)

    def w(k, shape):
        return jax.random.normal(k, shape, jnp.float32) * 0.05

    def per_head(m):                                # (E, E) -> (H, E, d)
        return m.reshape(E, H, d).transpose(1, 0, 2).astype(jnp.bfloat16)

    return dict(
        rms_g=jnp.ones((1, E), jnp.float32),
        wq=per_head(w(ks[0], (E, E))),
        wk=per_head(w(ks[1], (E, E))),
        wv=per_head(w(ks[2], (E, E))),
        w1=w(ks[3], (E, S)).astype(jnp.bfloat16),
        b1=jnp.zeros((1, S), jnp.float32),
        wg=w(ks[4], (S, S)).astype(jnp.bfloat16),
        bg=jnp.zeros((1, S), jnp.float32),
        wl=w(ks[5], (S, S)).astype(jnp.bfloat16),
        bl=jnp.zeros((1, S), jnp.float32),
        beta=jnp.ones((1, 1), jnp.float32),
        w2=w(ks[6], (S, E)).astype(jnp.bfloat16),
        b2=jnp.zeros((1, E), jnp.float32),
    )


# --------------------------------------------------------------------------
# Pure-JAX reference with identical dtype policy (bf16 MXU operands, f32
# accumulation/elementwise) for a tolerance check of the Pallas plumbing.
# --------------------------------------------------------------------------
def reference_forward(x, p, context_len, n_heads, causal):
    B, T, E = x.shape
    H = n_heads
    d = E // H
    cos = rope_cos_diag(context_len, d)[:T]
    inv_sqrt_d = jnp.float32(1.0 / math.sqrt(d))
    g = p['rms_g'][0]

    def rms(v):
        ms = jnp.mean(v * v, axis=-1, keepdims=True)
        return v * jax.lax.rsqrt(ms + 1e-6) * g

    xn = rms(x).astype(jnp.bfloat16)
    q = jnp.einsum('bte,hed->bhtd', xn, p['wq'], preferred_element_type=jnp.float32)
    k = jnp.einsum('bte,hed->bhtd', xn, p['wk'], preferred_element_type=jnp.float32)
    v = jnp.einsum('bte,hed->bhtd', xn, p['wv'], preferred_element_type=jnp.float32)
    q = (q * cos[None, None] * inv_sqrt_d).astype(jnp.bfloat16)
    k = (k * cos[None, None]).astype(jnp.bfloat16)
    v = v.astype(jnp.bfloat16)
    s = jnp.einsum('bhqd,bhkd->bhqk', q, k, preferred_element_type=jnp.float32)
    if causal:
        mask = jnp.triu(jnp.ones((T, T), dtype=bool), k=1)
        s = jnp.where(mask[None, None], -jnp.inf, s)
    a = jax.nn.softmax(s, axis=-1)
    o = jnp.einsum('bhqk,bhkd->bhqd', a.astype(jnp.bfloat16), v,
                   preferred_element_type=jnp.float32)
    attn = o.transpose(0, 2, 1, 3).reshape(B, T, E)
    x1 = x + attn
    xn2 = rms(x1).astype(jnp.bfloat16)
    h1 = jnp.einsum('bte,es->bts', xn2, p['w1'],
                    preferred_element_type=jnp.float32) + p['b1'][0]
    h1b = h1.astype(jnp.bfloat16)
    gate = jnp.einsum('bts,su->btu', h1b, p['wg'],
                      preferred_element_type=jnp.float32) + p['bg'][0]
    lin = jnp.einsum('bts,su->btu', h1b, p['wl'],
                     preferred_element_type=jnp.float32) + p['bl'][0]
    swish = gate * jax.nn.sigmoid(p['beta'][0, 0] * gate)
    y = jnp.einsum('bts,se->bte', (swish * lin).astype(jnp.bfloat16), p['w2'],
                   preferred_element_type=jnp.float32) + p['b2'][0]
    return y + x1


if __name__ == "__main__":
    EMBED, CTX, HEADS, SWIGLU_M = 32, 16, 4, 2.0
    B, T, CAUSAL = 2, 16, True

    key = jax.random.PRNGKey(0)
    kx, kp = jax.random.split(key)
    params = init_block_params(kp, EMBED, HEADS, SWIGLU_M)
    x = jax.random.normal(kx, (B, T, EMBED), jnp.float32)

    fwd = jax.jit(functools.partial(llama_block_forward, context_len=CTX,
                                    n_heads=HEADS, causal=CAUSAL))
    y = jax.block_until_ready(fwd(x, params))

    assert y.shape == (B, T, EMBED), y.shape
    assert bool(jnp.all(jnp.isfinite(y)))

    y_ref = reference_forward(x, params, CTX, HEADS, CAUSAL)
    err = float(jnp.max(jnp.abs(y - y_ref)))
    assert err < 2e-2, f"max |pallas - reference| = {err}"
    print("KERNEL_OK")
</pallas_src>

<mosaic_0001>
module attributes {stable_mosaic.version = 11 : i64} {
  func.func @ffn_kernel(%arg0: i32, %arg1: memref<16x32xf32, #tpu.memory_space<vmem>>, %arg2: memref<16x32xf32, #tpu.memory_space<vmem>>, %arg3: memref<1x32xf32, #tpu.memory_space<vmem>>, %arg4: memref<32x64xbf16, #tpu.memory_space<vmem>>, %arg5: memref<1x64xf32, #tpu.memory_space<vmem>>, %arg6: memref<64x64xbf16, #tpu.memory_space<vmem>>, %arg7: memref<1x64xf32, #tpu.memory_space<vmem>>, %arg8: memref<64x64xbf16, #tpu.memory_space<vmem>>, %arg9: memref<1x64xf32, #tpu.memory_space<vmem>>, %arg10: memref<1x1xf32, #tpu.memory_space<smem>>, %arg11: memref<64x32xbf16, #tpu.memory_space<vmem>>, %arg12: memref<1x32xf32, #tpu.memory_space<vmem>>, %arg13: memref<16x32xf32, #tpu.memory_space<vmem>>) attributes {dimension_semantics = [#tpu.dimension_semantics<parallel>], iteration_bounds = array<i64: 2>, scalar_prefetch = 0 : i64, scratch_operands = 0 : i64, tpu.core_type = #tpu.core_type<tc>, window_params = [{transform_indices = @transform_0, window_bounds = array<i64: 16, 32>}, {transform_indices = @transform_1, window_bounds = array<i64: 16, 32>}, {pipeline_mode = #tpu.pipeline_mode<synchronous>, transform_indices = @transform_2, window_bounds = array<i64: 1, 32>}, {pipeline_mode = #tpu.pipeline_mode<synchronous>, transform_indices = @transform_3, window_bounds = array<i64: 32, 64>}, {pipeline_mode = #tpu.pipeline_mode<synchronous>, transform_indices = @transform_4, window_bounds = array<i64: 1, 64>}, {pipeline_mode = #tpu.pipeline_mode<synchronous>, transform_indices = @transform_5, window_bounds = array<i64: 64, 64>}, {pipeline_mode = #tpu.pipeline_mode<synchronous>, transform_indices = @transform_6, window_bounds = array<i64: 1, 64>}, {pipeline_mode = #tpu.pipeline_mode<synchronous>, transform_indices = @transform_7, window_bounds = array<i64: 64, 64>}, {pipeline_mode = #tpu.pipeline_mode<synchronous>, transform_indices = @transform_8, window_bounds = array<i64: 1, 64>}, {transform_indices = @transform_9, window_bounds = array<i64: 1, 1>}, {pipeline_mode = #tpu.pipeline_mode<synchronous>, transform_indices = @transform_10, window_bounds = array<i64: 64, 32>}, {pipeline_mode = #tpu.pipeline_mode<synchronous>, transform_indices = @transform_11, window_bounds = array<i64: 1, 32>}, {transform_indices = @transform_12, window_bounds = array<i64: 16, 32>}]} {
    %c0 = arith.constant 0 : index
    %c0_0 = arith.constant 0 : index
    %0 = vector.load %arg1[%c0, %c0_0] : memref<16x32xf32, #tpu.memory_space<vmem>>, vector<16x32xf32>
    %c0_1 = arith.constant 0 : index
    %c0_2 = arith.constant 0 : index
    %1 = vector.load %arg2[%c0_1, %c0_2] : memref<16x32xf32, #tpu.memory_space<vmem>>, vector<16x32xf32>
    %2 = arith.addf %0, %1 : vector<16x32xf32>
    %3 = arith.mulf %2, %2 : vector<16x32xf32>
    %cst = arith.constant dense<0.000000e+00> : vector<16xf32>
    %4 = vector.multi_reduction <add>, %3, %cst [1] : vector<16x32xf32> to vector<16xf32>
    %5 = vector.shape_cast %4 : vector<16xf32> to vector<16x1xf32>
    %cst_3 = arith.constant 3.200000e+01 : f32
    %6 = vector.broadcast %cst_3 : f32 to vector<16x1xf32>
    %7 = arith.divf %5, %6 : vector<16x1xf32>
    %cst_4 = arith.constant 9.99999997E-7 : f32
    %8 = vector.broadcast %cst_4 : f32 to vector<16x1xf32>
    %9 = arith.addf %7, %8 : vector<16x1xf32>
    %10 = math.rsqrt %9 : vector<16x1xf32>
    %11 = vector.broadcast %10 : vector<16x1xf32> to vector<16x32xf32>
    %12 = arith.mulf %2, %11 : vector<16x32xf32>
    %c0_5 = arith.constant 0 : index
    %c0_6 = arith.constant 0 : index
    %13 = vector.load %arg3[%c0_5, %c0_6] : memref<1x32xf32, #tpu.memory_space<vmem>>, vector<1x32xf32>
    %14 = vector.broadcast %13 : vector<1x32xf32> to vector<16x32xf32>
    %15 = arith.mulf %12, %14 : vector<16x32xf32>
    %16 = arith.truncf %15 : vector<16x32xf32> to vector<16x32xbf16>
    %c0_7 = arith.constant 0 : index
    %c0_8 = arith.constant 0 : index
    %17 = vector.load %arg4[%c0_7, %c0_8] : memref<32x64xbf16, #tpu.memory_space<vmem>>, vector<32x64xbf16>
    %cst_9 = arith.constant dense<0.000000e+00> : vector<16x64xf32>
    %18 = tpu.matmul %16, %17, %cst_9 {dimension_numbers = #tpu.dot_dimension_numbers<[1], [0], [0], [1], [0, 0, 1, 1], [], []>} : vector<16x32xbf16>, vector<32x64xbf16>, vector<16x64xf32> -> vector<16x64xf32>
    %c0_10 = arith.constant 0 : index
    %c0_11 = arith.constant 0 : index
    %19 = vector.load %arg5[%c0_10, %c0_11] : memref<1x64xf32, #tpu.memory_space<vmem>>, vector<1x64xf32>
    %20 = vector.broadcast %19 : vector<1x64xf32> to vector<16x64xf32>
    %21 = arith.addf %18, %20 : vector<16x64xf32>
    %22 = arith.truncf %21 : vector<16x64xf32> to vector<16x64xbf16>
    %c0_12 = arith.constant 0 : index
    %c0_13 = arith.constant 0 : index
    %23 = vector.load %arg6[%c0_12, %c0_13] : memref<64x64xbf16, #tpu.memory_space<vmem>>, vector<64x64xbf16>
    %cst_14 = arith.constant dense<0.000000e+00> : vector<16x64xf32>
    %24 = tpu.matmul %22, %23, %cst_14 {dimension_numbers = #tpu.dot_dimension_numbers<[1], [0], [0], [1], [0, 0, 1, 1], [], []>} : vector<16x64xbf16>, vector<64x64xbf16>, vector<16x64xf32> -> vector<16x64xf32>
    %c0_15 = arith.constant 0 : index
    %c0_16 = arith.constant 0 : index
    %25 = vector.load %arg7[%c0_15, %c0_16] : memref<1x64xf32, #tpu.memory_space<vmem>>, vector<1x64xf32>
    %26 = vector.broadcast %25 : vector<1x64xf32> to vector<16x64xf32>
    %27 = arith.addf %24, %26 : vector<16x64xf32>
    %c0_17 = arith.constant 0 : index
    %c0_18 = arith.constant 0 : index
    %28 = vector.load %arg8[%c0_17, %c0_18] : memref<64x64xbf16, #tpu.memory_space<vmem>>, vector<64x64xbf16>
    %cst_19 = arith.constant dense<0.000000e+00> : vector<16x64xf32>
    %29 = tpu.matmul %22, %28, %cst_19 {dimension_numbers = #tpu.dot_dimension_numbers<[1], [0], [0], [1], [0, 0, 1, 1], [], []>} : vector<16x64xbf16>, vector<64x64xbf16>, vector<16x64xf32> -> vector<16x64xf32>
    %c0_20 = arith.constant 0 : index
    %c0_21 = arith.constant 0 : index
    %30 = vector.load %arg9[%c0_20, %c0_21] : memref<1x64xf32, #tpu.memory_space<vmem>>, vector<1x64xf32>
    %31 = vector.broadcast %30 : vector<1x64xf32> to vector<16x64xf32>
    %32 = arith.addf %29, %31 : vector<16x64xf32>
    %c0_22 = arith.constant 0 : index
    %c0_23 = arith.constant 0 : index
    %33 = memref.load %arg10[%c0_22, %c0_23] : memref<1x1xf32, #tpu.memory_space<smem>>
    %34 = vector.broadcast %33 : f32 to vector<16x64xf32>
    %35 = arith.mulf %34, %27 : vector<16x64xf32>
    %36 = arith.negf %35 : vector<16x64xf32>
    %37 = math.exp %36 : vector<16x64xf32>
    %cst_24 = arith.constant 1.000000e+00 : f32
    %38 = vector.broadcast %cst_24 : f32 to vector<16x64xf32>
    %39 = arith.addf %38, %37 : vector<16x64xf32>
    %40 = arith.divf %38, %39 : vector<16x64xf32>
    %41 = arith.mulf %27, %40 : vector<16x64xf32>
    %42 = arith.mulf %41, %32 : vector<16x64xf32>
    %43 = arith.truncf %42 : vector<16x64xf32> to vector<16x64xbf16>
    %c0_25 = arith.constant 0 : index
    %c0_26 = arith.constant 0 : index
    %44 = vector.load %arg11[%c0_25, %c0_26] : memref<64x32xbf16, #tpu.memory_space<vmem>>, vector<64x32xbf16>
    %cst_27 = arith.constant dense<0.000000e+00> : vector<16x32xf32>
    %45 = tpu.matmul %43, %44, %cst_27 {dimension_numbers = #tpu.dot_dimension_numbers<[1], [0], [0], [1], [0, 0, 1, 1], [], []>} : vector<16x64xbf16>, vector<64x32xbf16>, vector<16x32xf32> -> vector<16x32xf32>
    %c0_28 = arith.constant 0 : index
    %c0_29 = arith.constant 0 : index
    %46 = vector.load %arg12[%c0_28, %c0_29] : memref<1x32xf32, #tpu.memory_space<vmem>>, vector<1x32xf32>
    %47 = vector.broadcast %46 : vector<1x32xf32> to vector<16x32xf32>
    %48 = arith.addf %45, %47 : vector<16x32xf32>
    %49 = arith.addf %48, %2 : vector<16x32xf32>
    %c0_30 = arith.constant 0 : index
    %c0_31 = arith.constant 0 : index
    %50 = vector.load %arg13[%c0_30, %c0_31] : memref<16x32xf32, #tpu.memory_space<vmem>>, vector<16x32xf32>
    tpu.vector_store %arg13[%c0_30, %c0_31], %49 {strides = array<i32>} : memref<16x32xf32, #tpu.memory_space<vmem>>, vector<16x32xf32>,
    return
  }
  func.func @transform_0(%arg0: i32) -> (i32, i32) {
    %c0_i32 = arith.constant 0 : i32
    %c0_i32_0 = arith.constant 0 : i32
    return %arg0, %c0_i32 : i32, i32
  }
  func.func @transform_1(%arg0: i32) -> (i32, i32) {
    %c0_i32 = arith.constant 0 : i32
    %c0_i32_0 = arith.constant 0 : i32
    return %arg0, %c0_i32 : i32, i32
  }
  func.func @transform_2(%arg0: i32) -> (i32, i32) {
    %c0_i32 = arith.constant 0 : i32
    %c0_i32_0 = arith.constant 0 : i32
    %c0_i32_1 = arith.constant 0 : i32
    return %c0_i32, %c0_i32_0 : i32, i32
  }
  func.func @transform_3(%arg0: i32) -> (i32, i32) {
    %c0_i32 = arith.constant 0 : i32
    %c0_i32_0 = arith.constant 0 : i32
    %c0_i32_1 = arith.constant 0 : i32
    return %c0_i32, %c0_i32_0 : i32, i32
  }
  func.func @transform_4(%arg0: i32) -> (i32, i32) {
    %c0_i32 = arith.constant 0 : i32
    %c0_i32_0 = arith.constant 0 : i32
    %c0_i32_1 = arith.constant 0 : i32
    return %c0_i32, %c0_i32_0 : i32, i32
  }
  func.func @transform_5(%arg0: i32) -> (i32, i32) {
    %c0_i32 = arith.constant 0 : i32
    %c0_i32_0 = arith.constant 0 : i32
    %c0_i32_1 = arith.constant 0 : i32
    return %c0_i32, %c0_i32_0 : i32, i32
  }
  func.func @transform_6(%arg0: i32) -> (i32, i32) {
    %c0_i32 = arith.constant 0 : i32
    %c0_i32_0 = arith.constant 0 : i32
    %c0_i32_1 = arith.constant 0 : i32
    return %c0_i32, %c0_i32_0 : i32, i32
  }
  func.func @transform_7(%arg0: i32) -> (i32, i32) {
    %c0_i32 = arith.constant 0 : i32
    %c0_i32_0 = arith.constant 0 : i32
    %c0_i32_1 = arith.constant 0 : i32
    return %c0_i32, %c0_i32_0 : i32, i32
  }
  func.func @transform_8(%arg0: i32) -> (i32, i32) {
    %c0_i32 = arith.constant 0 : i32
    %c0_i32_0 = arith.constant 0 : i32
    %c0_i32_1 = arith.constant 0 : i32
    return %c0_i32, %c0_i32_0 : i32, i32
  }
  func.func @transform_9(%arg0: i32) -> (i32, i32) {
    %c0_i32 = arith.constant 0 : i32
    %c0_i32_0 = arith.constant 0 : i32
    %c0_i32_1 = arith.constant 0 : i32
    return %c0_i32, %c0_i32_0 : i32, i32
  }
  func.func @transform_10(%arg0: i32) -> (i32, i32) {
    %c0_i32 = arith.constant 0 : i32
    %c0_i32_0 = arith.constant 0 : i32
    %c0_i32_1 = arith.constant 0 : i32
    return %c0_i32, %c0_i32_0 : i32, i32
  }
  func.func @transform_11(%arg0: i32) -> (i32, i32) {
    %c0_i32 = arith.constant 0 : i32
    %c0_i32_0 = arith.constant 0 : i32
    %c0_i32_1 = arith.constant 0 : i32
    return %c0_i32, %c0_i32_0 : i32, i32
  }
  func.func @transform_12(%arg0: i32) -> (i32, i32) {
    %c0_i32 = arith.constant 0 : i32
    %c0_i32_0 = arith.constant 0 : i32
    return %arg0, %c0_i32 : i32, i32
  }
}

module attributes {stable_mosaic.version = 11 : i64} {
  func.func @attn_kernel(%arg0: i32, %arg1: i32, %arg2: memref<1x16x8xbf16, #tpu.memory_space<vmem>>, %arg3: memref<1x16x8xbf16, #tpu.memory_space<vmem>>, %arg4: memref<1x16x8xbf16, #tpu.memory_space<vmem>>, %arg5: memref<1x16x8xf32, #tpu.memory_space<vmem>>) attributes {dimension_semantics = [#tpu.dimension_semantics<parallel>, #tpu.dimension_semantics<parallel>], iteration_bounds = array<i64: 8, 1>, scalar_prefetch = 0 : i64, scratch_operands = 0 : i64, tpu.core_type = #tpu.core_type<tc>, window_params = [{transform_indices = @transform_0, window_bounds = array<i64: 1, 16, 8>}, {transform_indices = @transform_1, window_bounds = array<i64: 1, 16, 8>}, {transform_indices = @transform_2, window_bounds = array<i64: 1, 16, 8>}, {transform_indices = @transform_3, window_bounds = array<i64: 1, 16, 8>}]} {
    %c0 = arith.constant 0 : index
    %c0_0 = arith.constant 0 : index
    %c0_1 = arith.constant 0 : index
    %0 = vector.load %arg2[%c0, %c0_0, %c0_1] : memref<1x16x8xbf16, #tpu.memory_space<vmem>>, vector<1x16x8xbf16>
    %1 = vector.shape_cast %0 : vector<1x16x8xbf16> to vector<16x8xbf16>
    %c0_2 = arith.constant 0 : index
    %c0_3 = arith.constant 0 : index
    %c0_4 = arith.constant 0 : index
    %2 = vector.load %arg3[%c0_2, %c0_3, %c0_4] : memref<1x16x8xbf16, #tpu.memory_space<vmem>>, vector<1x16x8xbf16>
    %3 = vector.shape_cast %2 : vector<1x16x8xbf16> to vector<16x8xbf16>
    %c0_5 = arith.constant 0 : index
    %c0_6 = arith.constant 0 : index
    %c0_7 = arith.constant 0 : index
    %4 = vector.load %arg4[%c0_5, %c0_6, %c0_7] : memref<1x16x8xbf16, #tpu.memory_space<vmem>>, vector<1x16x8xbf16>
    %5 = vector.shape_cast %4 : vector<1x16x8xbf16> to vector<16x8xbf16>
    "tpu.trace_start"() <{level = 10 : i32, message = "qd,kd->qk"}> : () -> ()
    %cst = arith.constant dense<0.000000e+00> : vector<16x16xf32>
    %6 = tpu.matmul %1, %3, %cst {dimension_numbers = #tpu.dot_dimension_numbers<[1], [1], [0], [0], [0, 0, 1, 0], [], []>} : vector<16x8xbf16>, vector<16x8xbf16>, vector<16x16xf32> -> vector<16x16xf32>
    "tpu.trace_stop"() : () -> ()
    %c16_i32 = arith.constant 16 : i32
    %7 = arith.muli %arg1, %c16_i32 : i32
    %8 = tpu.iota {dimensions = array<i32: 0>} : vector<16x16xi32>
    %9 = vector.broadcast %7 : i32 to vector<16x16xi32>
    %10 = arith.addi %9, %8 : vector<16x16xi32>
    %11 = tpu.iota {dimensions = array<i32: 1>} : vector<16x16xi32>
    %12 = arith.cmpi sgt, %11, %10 : vector<16x16xi32>
    %cst_8 = arith.constant 0xFF800000 : f32
    %13 = vector.broadcast %cst_8 : f32 to vector<16x16xf32>
    %14 = arith.select %12, %13, %6 : vector<16x16xi1>, vector<16x16xf32>
    %cst_9 = arith.constant dense<0xFF800000> : vector<16xf32>
    %15 = vector.multi_reduction <maximumf>, %14, %cst_9 [1] : vector<16x16xf32> to vector<16xf32>
    %16 = vector.shape_cast %15 : vector<16xf32> to vector<16x1xf32>
    %17 = vector.broadcast %16 : vector<16x1xf32> to vector<16x16xf32>
    %18 = arith.subf %14, %17 : vector<16x16xf32>
    %19 = math.exp %18 : vector<16x16xf32>
    %cst_10 = arith.constant dense<0.000000e+00> : vector<16xf32>
    %20 = vector.multi_reduction <add>, %19, %cst_10 [1] : vector<16x16xf32> to vector<16xf32>
    %21 = vector.shape_cast %20 : vector<16xf32> to vector<16x1xf32>
    %22 = vector.broadcast %21 : vector<16x1xf32> to vector<16x16xf32>
    %23 = arith.divf %19, %22 : vector<16x16xf32>
    %24 = arith.truncf %23 : vector<16x16xf32> to vector<16x16xbf16>
    "tpu.trace_start"() <{level = 10 : i32, message = "qk,kd->qd"}> : () -> ()
    %cst_11 = arith.constant dense<0.000000e+00> : vector<16x8xf32>
    %25 = tpu.matmul %24, %5, %cst_11 {dimension_numbers = #tpu.dot_dimension_numbers<[1], [0], [0], [1], [0, 0, 1, 1], [], []>} : vector<16x16xbf16>, vector<16x8xbf16>, vector<16x8xf32> -> vector<16x8xf32>
    "tpu.trace_stop"() : () -> ()
    %c0_12 = arith.constant 0 : index
    %c0_13 = arith.constant 0 : index
    %c0_14 = arith.constant 0 : index
    %26 = vector.load %arg5[%c0_12, %c0_13, %c0_14] : memref<1x16x8xf32, #tpu.memory_space<vmem>>, vector<1x16x8xf32>
    %27 = vector.shape_cast %26 : vector<1x16x8xf32> to vector<16x8xf32>
    %28 = vector.shape_cast %25 : vector<16x8xf32> to vector<1x16x8xf32>
    tpu.vector_store %arg5[%c0_12, %c0_13, %c0_14], %28 {strides = array<i32>} : memref<1x16x8xf32, #tpu.memory_space<vmem>>, vector<1x16x8xf32>,
    return
  }
  func.func @transform_0(%arg0: i32, %arg1: i32) -> (i32, i32, i32) {
    %c0_i32 = arith.constant 0 : i32
    %c0_i32_0 = arith.constant 0 : i32
    return %arg0, %arg1, %c0_i32 : i32, i32, i32
  }
  func.func @transform_1(%arg0: i32, %arg1: i32) -> (i32, i32, i32) {
    %c0_i32 = arith.constant 0 : i32
    %c0_i32_0 = arith.constant 0 : i32
    %c0_i32_1 = arith.constant 0 : i32
    return %arg0, %c0_i32, %c0_i32_0 : i32, i32, i32
  }
  func.func @transform_2(%arg0: i32, %arg1: i32) -> (i32, i32, i32) {
    %c0_i32 = arith.constant 0 : i32
    %c0_i32_0 = arith.constant 0 : i32
    %c0_i32_1 = arith.constant 0 : i32
    return %arg0, %c0_i32, %c0_i32_0 : i32, i32, i32
  }
  func.func @transform_3(%arg0: i32, %arg1: i32) -> (i32, i32, i32) {
    %c0_i32 = arith.constant 0 : i32
    %c0_i32_0 = arith.constant 0 : i32
    return %arg0, %arg1, %c0_i32 : i32, i32, i32
  }
}

module attributes {stable_mosaic.version = 11 : i64} {
  func.func @qkv_kernel(%arg0: i32, %arg1: i32, %arg2: i32, %arg3: memref<1x16x32xf32, #tpu.memory_space<vmem>>, %arg4: memref<1x32xf32, #tpu.memory_space<vmem>>, %arg5: memref<1x32x8xbf16, #tpu.memory_space<vmem>>, %arg6: memref<1x32x8xbf16, #tpu.memory_space<vmem>>, %arg7: memref<1x32x8xbf16, #tpu.memory_space<vmem>>, %arg8: memref<16x8xf32, #tpu.memory_space<vmem>>, %arg9: memref<1x1x16x8xbf16, #tpu.memory_space<vmem>>, %arg10: memref<1x1x16x8xbf16, #tpu.memory_space<vmem>>, %arg11: memref<1x1x16x8xbf16, #tpu.memory_space<vmem>>, %arg12: memref<16x32xf32, #tpu.memory_space<vmem>>) attributes {dimension_semantics = [#tpu.dimension_semantics<parallel>, #tpu.dimension_semantics<parallel>, #tpu.dimension_semantics<arbitrary>], iteration_bounds = array<i64: 2, 1, 4>, scalar_prefetch = 0 : i64, scratch_operands = 1 : i64, tpu.core_type = #tpu.core_type<tc>, window_params = [{transform_indices = @transform_0, window_bounds = array<i64: 1, 16, 32>}, {pipeline_mode = #tpu.pipeline_mode<synchronous>, transform_indices = @transform_1, window_bounds = array<i64: 1, 32>}, {transform_indices = @transform_2, window_bounds = array<i64: 1, 32, 8>}, {transform_indices = @transform_3, window_bounds = array<i64: 1, 32, 8>}, {transform_indices = @transform_4, window_bounds = array<i64: 1, 32, 8>}, {transform_indices = @transform_5, window_bounds = array<i64: 16, 8>}, {transform_indices = @transform_6, window_bounds = array<i64: 1, 1, 16, 8>}, {transform_indices = @transform_7, window_bounds = array<i64: 1, 1, 16, 8>}, {transform_indices = @transform_8, window_bounds = array<i64: 1, 1, 16, 8>}]} {
    %c0_i32 = arith.constant 0 : i32
    %0 = arith.cmpi eq, %arg2, %c0_i32 : i32
    %1 = arith.extui %0 : i1 to i32
    %c0_i32_0 = arith.constant 0 : i32
    %2 = arith.cmpi ne, %1, %c0_i32_0 : i32
    scf.if %2 {
      %c0_28 = arith.constant 0 : index
      %c0_29 = arith.constant 0 : index
      %c0_30 = arith.constant 0 : index
      %31 = vector.load %arg3[%c0_28, %c0_29, %c0_30] : memref<1x16x32xf32, #tpu.memory_space<vmem>>, vector<1x16x32xf32>
      %32 = vector.shape_cast %31 : vector<1x16x32xf32> to vector<16x32xf32>
      %33 = arith.mulf %32, %32 : vector<16x32xf32>
      %cst_31 = arith.constant dense<0.000000e+00> : vector<16xf32>
      %34 = vector.multi_reduction <add>, %33, %cst_31 [1] : vector<16x32xf32> to vector<16xf32>
      %35 = vector.shape_cast %34 : vector<16xf32> to vector<16x1xf32>
      %cst_32 = arith.constant 3.200000e+01 : f32
      %36 = vector.broadcast %cst_32 : f32 to vector<16x1xf32>
      %37 = arith.divf %35, %36 : vector<16x1xf32>
      %cst_33 = arith.constant 9.99999997E-7 : f32
      %38 = vector.broadcast %cst_33 : f32 to vector<16x1xf32>
      %39 = arith.addf %37, %38 : vector<16x1xf32>
      %40 = math.rsqrt %39 : vector<16x1xf32>
      %41 = vector.broadcast %40 : vector<16x1xf32> to vector<16x32xf32>
      %42 = arith.mulf %32, %41 : vector<16x32xf32>
      %c0_34 = arith.constant 0 : index
      %c0_35 = arith.constant 0 : index
      %43 = vector.load %arg4[%c0_34, %c0_35] : memref<1x32xf32, #tpu.memory_space<vmem>>, vector<1x32xf32>
      %44 = vector.broadcast %43 : vector<1x32xf32> to vector<16x32xf32>
      %45 = arith.mulf %42, %44 : vector<16x32xf32>
      %c0_36 = arith.constant 0 : index
      %c0_37 = arith.constant 0 : index
      %46 = vector.load %arg12[%c0_36, %c0_37] : memref<16x32xf32, #tpu.memory_space<vmem>>, vector<16x32xf32>
      tpu.vector_store %arg12[%c0_36, %c0_37], %45 {strides = array<i32>} : memref<16x32xf32, #tpu.memory_space<vmem>>, vector<16x32xf32>,
    } else {
    }
    %c0 = arith.constant 0 : index
    %c0_1 = arith.constant 0 : index
    %3 = vector.load %arg12[%c0, %c0_1] : memref<16x32xf32, #tpu.memory_space<vmem>>, vector<16x32xf32>
    %4 = arith.truncf %3 : vector<16x32xf32> to vector<16x32xbf16>
    %c0_2 = arith.constant 0 : index
    %c0_3 = arith.constant 0 : index
    %5 = vector.load %arg8[%c0_2, %c0_3] : memref<16x8xf32, #tpu.memory_space<vmem>>, vector<16x8xf32>
    %c0_4 = arith.constant 0 : index
    %c0_5 = arith.constant 0 : index
    %c0_6 = arith.constant 0 : index
    %6 = vector.load %arg5[%c0_4, %c0_5, %c0_6] : memref<1x32x8xbf16, #tpu.memory_space<vmem>>, vector<1x32x8xbf16>
    %7 = vector.shape_cast %6 : vector<1x32x8xbf16> to vector<32x8xbf16>
    %cst = arith.constant dense<0.000000e+00> : vector<16x8xf32>
    %8 = tpu.matmul %4, %7, %cst {dimension_numbers = #tpu.dot_dimension_numbers<[1], [0], [0], [1], [0, 0, 1, 1], [], []>} : vector<16x32xbf16>, vector<32x8xbf16>, vector<16x8xf32> -> vector<16x8xf32>
    %c0_7 = arith.constant 0 : index
    %c0_8 = arith.constant 0 : index
    %c0_9 = arith.constant 0 : index
    %9 = vector.load %arg6[%c0_7, %c0_8, %c0_9] : memref<1x32x8xbf16, #tpu.memory_space<vmem>>, vector<1x32x8xbf16>
    %10 = vector.shape_cast %9 : vector<1x32x8xbf16> to vector<32x8xbf16>
    %cst_10 = arith.constant dense<0.000000e+00> : vector<16x8xf32>
    %11 = tpu.matmul %4, %10, %cst_10 {dimension_numbers = #tpu.dot_dimension_numbers<[1], [0], [0], [1], [0, 0, 1, 1], [], []>} : vector<16x32xbf16>, vector<32x8xbf16>, vector<16x8xf32> -> vector<16x8xf32>
    %c0_11 = arith.constant 0 : index
    %c0_12 = arith.constant 0 : index
    %c0_13 = arith.constant 0 : index
    %12 = vector.load %arg7[%c0_11, %c0_12, %c0_13] : memref<1x32x8xbf16, #tpu.memory_space<vmem>>, vector<1x32x8xbf16>
    %13 = vector.shape_cast %12 : vector<1x32x8xbf16> to vector<32x8xbf16>
    %cst_14 = arith.constant dense<0.000000e+00> : vector<16x8xf32>
    %14 = tpu.matmul %4, %13, %cst_14 {dimension_numbers = #tpu.dot_dimension_numbers<[1], [0], [0], [1], [0, 0, 1, 1], [], []>} : vector<16x32xbf16>, vector<32x8xbf16>, vector<16x8xf32> -> vector<16x8xf32>
    %15 = arith.mulf %8, %5 : vector<16x8xf32>
    %cst_15 = arith.constant 0.353553385 : f32
    %16 = vector.broadcast %cst_15 : f32 to vector<16x8xf32>
    %17 = arith.mulf %15, %16 : vector<16x8xf32>
    %18 = arith.truncf %17 : vector<16x8xf32> to vector<16x8xbf16>
    %c0_16 = arith.constant 0 : index
    %c0_17 = arith.constant 0 : index
    %c0_18 = arith.constant 0 : index
    %c0_19 = arith.constant 0 : index
    %19 = vector.load %arg9[%c0_16, %c0_17, %c0_18, %c0_19] : memref<1x1x16x8xbf16, #tpu.memory_space<vmem>>, vector<1x1x16x8xbf16>
    %20 = vector.shape_cast %19 : vector<1x1x16x8xbf16> to vector<16x8xbf16>
    %21 = vector.shape_cast %18 : vector<16x8xbf16> to vector<1x1x16x8xbf16>
    tpu.vector_store %arg9[%c0_16, %c0_17, %c0_18, %c0_19], %21 {strides = array<i32>} : memref<1x1x16x8xbf16, #tpu.memory_space<vmem>>, vector<1x1x16x8xbf16>,
    %22 = arith.mulf %11, %5 : vector<16x8xf32>
    %23 = arith.truncf %22 : vector<16x8xf32> to vector<16x8xbf16>
    %c0_20 = arith.constant 0 : index
    %c0_21 = arith.constant 0 : index
    %c0_22 = arith.constant 0 : index
    %c0_23 = arith.constant 0 : index
    %24 = vector.load %arg10[%c0_20, %c0_21, %c0_22, %c0_23] : memref<1x1x16x8xbf16, #tpu.memory_space<vmem>>, vector<1x1x16x8xbf16>
    %25 = vector.shape_cast %24 : vector<1x1x16x8xbf16> to vector<16x8xbf16>
    %26 = vector.shape_cast %23 : vector<16x8xbf16> to vector<1x1x16x8xbf16>
    tpu.vector_store %arg10[%c0_20, %c0_21, %c0_22, %c0_23], %26 {strides = array<i32>} : memref<1x1x16x8xbf16, #tpu.memory_space<vmem>>, vector<1x1x16x8xbf16>,
    %27 = arith.truncf %14 : vector<16x8xf32> to vector<16x8xbf16>
    %c0_24 = arith.constant 0 : index
    %c0_25 = arith.constant 0 : index
    %c0_26 = arith.constant 0 : index
    %c0_27 = arith.constant 0 : index
    %28 = vector.load %arg11[%c0_24, %c0_25, %c0_26, %c0_27] : memref<1x1x16x8xbf16, #tpu.memory_space<vmem>>, vector<1x1x16x8xbf16>
    %29 = vector.shape_cast %28 : vector<1x1x16x8xbf16> to vector<16x8xbf16>
    %30 = vector.shape_cast %27 : vector<16x8xbf16> to vector<1x1x16x8xbf16>
    tpu.vector_store %arg11[%c0_24, %c0_25, %c0_26, %c0_27], %30 {strides = array<i32>} : memref<1x1x16x8xbf16, #tpu.memory_space<vmem>>, vector<1x1x16x8xbf16>,
    return
  }
  func.func @transform_0(%arg0: i32, %arg1: i32, %arg2: i32) -> (i32, i32, i32) {
    %c0_i32 = arith.constant 0 : i32
    %c0_i32_0 = arith.constant 0 : i32
    return %arg0, %arg1, %c0_i32 : i32, i32, i32
  }
  func.func @transform_1(%arg0: i32, %arg1: i32, %arg2: i32) -> (i32, i32) {
    %c0_i32 = arith.constant 0 : i32
    %c0_i32_0 = arith.constant 0 : i32
    %c0_i32_1 = arith.constant 0 : i32
    return %c0_i32, %c0_i32_0 : i32, i32
  }
  func.func @transform_2(%arg0: i32, %arg1: i32, %arg2: i32) -> (i32, i32, i32) {
    %c0_i32 = arith.constant 0 : i32
    %c0_i32_0 = arith.constant 0 : i32
    %c0_i32_1 = arith.constant 0 : i32
    return %arg2, %c0_i32, %c0_i32_0 : i32, i32, i32
  }
  func.func @transform_3(%arg0: i32, %arg1: i32, %arg2: i32) -> (i32, i32, i32) {
    %c0_i32 = arith.constant 0 : i32
    %c0_i32_0 = arith.constant 0 : i32
    %c0_i32_1 = arith.constant 0 : i32
    return %arg2, %c0_i32, %c0_i32_0 : i32, i32, i32
  }
  func.func @transform_4(%arg0: i32, %arg1: i32, %arg2: i32) -> (i32, i32, i32) {
    %c0_i32 = arith.constant 0 : i32
    %c0_i32_0 = arith.constant 0 : i32
    %c0_i32_1 = arith.constant 0 : i32
    return %arg2, %c0_i32, %c0_i32_0 : i32, i32, i32
  }
  func.func @transform_5(%arg0: i32, %arg1: i32, %arg2: i32) -> (i32, i32) {
    %c0_i32 = arith.constant 0 : i32
    %c0_i32_0 = arith.constant 0 : i32
    return %arg1, %c0_i32 : i32, i32
  }
  func.func @transform_6(%arg0: i32, %arg1: i32, %arg2: i32) -> (i32, i32, i32, i32) {
    %c0_i32 = arith.constant 0 : i32
    %c0_i32_0 = arith.constant 0 : i32
    return %arg0, %arg2, %arg1, %c0_i32 : i32, i32, i32, i32
  }
  func.func @transform_7(%arg0: i32, %arg1: i32, %arg2: i32) -> (i32, i32, i32, i32) {
    %c0_i32 = arith.constant 0 : i32
    %c0_i32_0 = arith.constant 0 : i32
    return %arg0, %arg2, %arg1, %c0_i32 : i32, i32, i32, i32
  }
  func.func @transform_8(%arg0: i32, %arg1: i32, %arg2: i32) -> (i32, i32, i32, i32) {
    %c0_i32 = arith.constant 0 : i32
    %c0_i32_0 = arith.constant 0 : i32
    return %arg0, %arg2, %arg1, %c0_i32 : i32, i32, i32, i32
  }
}

</mosaic_0001>

<bundles_post_ra>
// kernel: llama_block_forward.4
= control target key start
LH: loop header
LB: loop body
LE: loop exit
PB: predicated region body
PF: predicated region fallthrough
CT: control target
= control target key end

     0   :  { %s599_s12 = smov 0   ;;  %s601_s13 = smov 0   ;;  %s656_s0 = inlined_call_operand.vmem [shape: bf16[8,16,8], index: 0, kind: input, shape index: {}]   ;;  %s657_s1 = inlined_call_operand.vmem [shape: bf16[8,16,8], index: 1, kind: input, shape index: {}]   ;;  %s658_s2 = inlined_call_operand.vmem [shape: bf16[8,16,8], index: 2, kind: input, shape index: {}]   ;;  %s659_s3 = inlined_call_operand.vmem [shape: f32[8,16,8], index: 3, kind: output, shape index: {}]  }
   0x1   :  { %s603_s14 = smov 0  }
   0x2 LB: > { %s25_s15 = sadd.s32 1, %s573_s13  ;;  %p491_p0 = scmp.ge.s32.totalorder %s577_s14, 1  ;;  %s577_s14 = sphi %s603_s14, %s13_s14   ;;  %s573_s13 = sphi %s601_s13, %s661_s13   ;;  %s569_s12 = sphi %s599_s12, %s660_s12  }
   0x3   : > { %p27_p1 = scmp.ge.s32.totalorder %s25_s15, 8  ;;  %p178_p2 = scmp.lt.s32.totalorder %s577_s14, 9 }
   0x5   : > { %s663_s15 = smov (%p27_p1, %s25_s15), 0  ;;  %p179_p3 = pnand %p491_p0, %p178_p2 }
   0x6   : > { %p221_p4 = scmp.lt.s32.totalorder (!%p179_p3), %s569_s12, 7 }
   0x7   : > { %182 = sbr.rel (%p179_p3) target bundleno = 560 (0x230), region = 32 }
   0xc   : > { %s665_s12 = smov (!%p221_p4, %s569_s12), 7  ;;  %vm267_vm0 = vcmask 64512   ;;  %v289_v3 = vlaneseq  ;;  %vm301_vm2 = vcmask 130048  }
   0xd   : > { %s620_s16 = sshll.u32 %s665_s12, 3  ;;  %s519_s26 = sshll.u32 %s665_s12, 4 }
   0xe   : > { %s234_s19 = scalar_lea.vmem %s657_s1, %s620_s16  ;;  %s228_s22 = scalar_lea.vmem %s656_s0, %s620_s16  ;;  %v290_v4 = vshrl.u32 %v289_v3, 7  ;;  %v296_v5 = vand.u32 127, %v289_v3 }
   0xf   : > { %v521_v0 = vld [vmem:[%s234_s19] sm:$0xff]  ;;  %s239_s25 = scalar_lea.vmem %s658_s2, %s620_s16  ;;  %s248_s29 = scalar_lea.vmem %s659_s3, %s519_s26 }
  0x10   : > { %v272_v1 = vsel %vm267_vm0, %v521_v0, 0  ;;  %v520_v2 = vld [vmem:[%s228_s22] sm:$0xff]  ;;  %vm297_vm1 = vcmp.gt.s32.totalorder %v296_v5, %v290_v4  ;;  %v291_v9 = vadd.s32 8, %v290_v4 }
  0x11   : > { %281 = vmatpush.bf16.xpose.msra.mxu0 %v272_v1  ;;  %v522_v23 = vld [vmem:[%s239_s25] sm:$0xff] }
  0x12   : > { %vm298_vm3 = vcmp.gt.s32.totalorder %v296_v5, %v291_v9  ;;  %367 = vmatpush.bf16.msra.mxu1 %v522_v23 }
  0x18   : > { %508 = vmatmul.msk.bf16.vlgmr.msra.gmra.mxu0 %vm267_vm0, %v520_v2 }
  0x95   : > { %v283_v6 = vpop.f32.mrf.mxu0 }
  0x96   : > { %v299_v7 = vsel %vm297_vm1, -inf, %v283_v6 }
  0x97   : > { %v302_v8 = vsel %vm301_vm2, %v299_v7, -inf }
  0x98   : > { %303 = vmax.xlane.f32.xlu0 %v302_v8 }
  0x9d   : > { %v285_v10 = vpop.f32.mrf.mxu0 }
  0x9e   : > { %v300_v11 = vsel %vm298_vm3, -inf, %v285_v10 }
  0x9f   : > { %v305_v12 = vsel %vm301_vm2, %v300_v11, -inf }
  0xa0   : > { %306 = vmax.xlane.f32.xlu0 %v305_v12 }
 0x10b   : > { %v304_v13 = vpop.xlane.xlu0 %303 }
 0x10c   : > { %v308_v14 = vsub.f32 %v299_v7, %v304_v13 }
 0x10e   : > { %v310_v15 = vmul.f32 1.442695, %v308_v14 }
 0x110   : > { %547 = vpow2.f32 %v310_v15 }
 0x113   : > { %v307_v16 = vpop.xlane.xlu0 %306 }
 0x114   : > { %v309_v17 = vsub.f32 %v300_v11, %v307_v16 }
 0x116   : > { %v548_v18 = vpop.eup %547  ;;  %v312_v19 = vmul.f32 1.442695, %v309_v17 }
 0x117   : > { %v314_v20 = vsel %vm301_vm2, %v548_v18, 0.0 }
 0x118   : > { %549 = vpow2.f32 %v312_v19  ;;  %315 = vadd.xlane.f32.xlu1 %v314_v20 }
 0x11e   : > { %v550_v21 = vpop.eup %549 }
 0x11f   : > { %v317_v22 = vsel %vm301_vm2, %v550_v21, 0.0 }
 0x120   : > { %318 = vadd.xlane.f32.xlu1 %v317_v22 }
 0x18b   : > { %v316_v24 = vpop.xlane.xlu1 %315 }
 0x18c   : > { %551 = vrcp.f32 %v316_v24  ;;  %v331_v33 = vand.u32 2147483648, %v316_v24  ;;  %vm325_vm5 = vweird.f32 %v316_v24  ;;  %v329_v34 = vand.u32 2147483647, %v316_v24 }
 0x18e   : > { %v332_v40 = vor.u32 1.1754944e-38, %v331_v33  ;;  %vm330_vm8 = vcmp.eq.f32.partialorder %v329_v34, 8.507059e+37 }
 0x192   : > { %v552_v25 = vpop.eup %551 }
 0x193   : > { %v321_v26 = vmul.f32 %v552_v25, %v316_v24  ;;  %v319_v27 = vpop.xlane.xlu1 %318  ;;  %vm326_vm4 = vweird.f32 %v552_v25 }
 0x194   : > { %553 = vrcp.f32 %v319_v27  ;;  %vm327_vm6 = vmor %vm325_vm5, %vm326_vm4  ;;  %v346_v36 = vand.u32 2147483648, %v319_v27  ;;  %v344_v38 = vand.u32 2147483647, %v319_v27  ;;  %vm340_vm9 = vweird.f32 %v319_v27 }
 0x195   : > { %v322_v28 = vsub.f32 1.0, %v321_v26 }
 0x196   : > { %v347_v42 = vor.u32 1.1754944e-38, %v346_v36  ;;  %vm345_vm11 = vcmp.eq.f32.partialorder %v344_v38, 8.507059e+37 }
 0x197   : > { %v323_v29 = vmul.f32 %v552_v25, %v322_v28 }
 0x199   : > { %v324_v31 = vadd.f32 %v552_v25, %v323_v29 }
 0x19a   : > { %v554_v30 = vpop.eup %553 }
 0x19b   : > { %v336_v32 = vmul.f32 %v554_v30, %v319_v27  ;;  %vm341_vm7 = vweird.f32 %v554_v30  ;;  %v328_v39 = vsel %vm327_vm6, %v552_v25, %v324_v31 }
 0x19c   : > { %vm342_vm10 = vmor %vm340_vm9, %vm341_vm7  ;;  %v333_v43 = vsel %vm330_vm8, %v332_v40, %v328_v39 }
 0x19d   : > { %v337_v35 = vsub.f32 1.0, %v336_v32  ;;  %v334_v46 = vmul.f32 %v548_v18, %v333_v43 }
 0x19f   : > { %v338_v37 = vmul.f32 %v554_v30, %v337_v35 }
 0x1a1   : > { %v339_v41 = vadd.f32 %v554_v30, %v338_v37 }
 0x1a3   : > { %v343_v44 = vsel %vm342_vm10, %v554_v30, %v339_v41 }
 0x1a4   : > { %v348_v45 = vsel %vm345_vm11, %v347_v42, %v343_v44 }
 0x1a5   : > { %v349_v47 = vmul.f32 %v550_v21, %v348_v45 }
 0x1a7   : > { %v350_v48 = vpack.c.bf16 %v349_v47, %v334_v46 }
 0x1a9   : > { %513 = vmatmul.msk.bf16.vlgmr.msra.gmra.mxu1 %vm301_vm2, %v350_v48 }
 0x226   : > { %v369_v49 = vpop.f32.mrf.mxu1 }
 0x227   : > { %374 = vst.msk [vmem:[%s248_s29] sm:$0xff] %vm267_vm0, %v369_v49 }
 0x22e   : > { %v371_v50 = vpop.f32.mrf.mxu1 }
 0x22f   : > { %375 = vst.msk [vmem:[%s248_s29 + $0x8] sm:$0xff] %vm267_vm0, %v371_v50 }
 0x230 PF: > { %s13_s14 = sadd.s32 1, %s577_s14   ;;  %s660_s12 = smov %s573_s13 }
 0x231   : > { %p10_p5 = scmp.ge.s32.totalorder %s13_s14, 10   ;;  %s661_s13 = smov %s663_s15 }
 0x233   :  { %12 = sbr.rel (!%p10_p5) target bundleno = 2 (0x2), region = 68 }

// kernel: llama_block_forward.3
= control target key start
LH: loop header
LB: loop body
LE: loop exit
PB: predicated region body
PF: predicated region fallthrough
CT: control target
= control target key end

     0   :  { %s1175_s27 = smov 0   ;;  %s1177_s28 = smov 0   ;;  %s1289_s0 = inlined_call_operand.vmem [shape: f32[2,16,32], index: 0, kind: input, shape index: {}]   ;;  %s1290_s1 = inlined_call_operand.vmem [shape: f32[1,32], index: 1, kind: input, shape index: {}]   ;;  %s1291_s2 = inlined_call_operand.vmem [shape: bf16[4,32,8], index: 2, kind: input, shape index: {}]   ;;  %s1292_s3 = inlined_call_operand.vmem [shape: bf16[4,32,8], index: 3, kind: input, shape index: {}]   ;;  %s1293_s4 = inlined_call_operand.vmem [shape: bf16[4,32,8], index: 4, kind: input, shape index: {}]   ;;  %s1294_s5 = inlined_call_operand.vmem [shape: f32[16,8], index: 5, kind: input, shape index: {}]   ;;  %s1295_s6 = inlined_call_operand.vmem [shape: bf16[2,4,16,8], index: 6, kind: output, shape index: {0}]   ;;  %s1296_s7 = inlined_call_operand.vmem [shape: bf16[2,4,16,8], index: 7, kind: output, shape index: {1}]   ;;  %s1297_s8 = inlined_call_operand.vmem [shape: bf16[2,4,16,8], index: 8, kind: output, shape index: {2}]  }
   0x1   :  { %1298 = sst [smem:[#allocation5_spill]] %s1289_s0  ;;  %s1179_s29 = smov 0  }
   0x2   :  { %1299 = sst [smem:[#allocation6_spill]] %s1291_s2  ;;  %s1181_s30 = smov 0  }
   0x3   :  { %1300 = sst [smem:[#allocation7_spill]] %s1292_s3  ;;  %s1183_s9 = smov 0  }
   0x4 LB: > { %s31_s10 = sadd.s32 1, %s1119_s29  ;;  %s38_s11 = sadd.s32 1, %s1123_s30  ;;  %s1127_s9 = sphi %s1183_s9, %s19_s9   ;;  %s1123_s30 = sphi %s1181_s30, %s1311_s30   ;;  %s1119_s29 = sphi %s1179_s29, %s1310_s29   ;;  %s1115_s28 = sphi %s1177_s28, %s1309_s28   ;;  %s1111_s27 = sphi %s1175_s27, %s1308_s27  }
   0x5   : > { %p32_p0 = scmp.ge.s32.totalorder %s31_s10, 4  ;;  %p983_p1 = scmp.ge.s32.totalorder %s1127_s9, 1 }
   0x6   : > { %p346_p2 = scmp.lt.s32.totalorder %s1127_s9, 9 }
   0x7   : > { %s1313_s10 = smov (%p32_p0, %s31_s10), 0  ;;  %s1315_s11 = smov (!%p32_p0, %s38_s11), %s1123_s30 }
   0x8   : > { %1301 = sst [smem:[#allocation3_spill]] %s1313_s10  ;;  %p347_p3 = pnand %p983_p1, %p346_p2 }
   0x9   : > { %p40_p4 = scmp.ge.s32.totalorder %s1315_s11, 2  ;;  %p439_p5 = scmp.lt.s32.totalorder (!%p347_p3), %s1115_s28, 1 }
   0xa   : > { %350 = sbr.rel (%p347_p3) target bundleno = 334 (0x14e), region = 44  ;;  %p448_p6 = scmp.lt.s32.totalorder (!%p347_p3), %s1111_s27, 3 }
   0xb   : > { %s1317_s11 = smov (%p40_p4, %s1315_s11), 0  ;;  %s1303_s0 = sld [smem:[#allocation5_spill]] (!%p347_p3) }
   0xc   : > { %1302 = sst [smem:[#allocation4_spill]] %s1317_s11  ;;  %p1001_p7 = scmp.ne.s32.totalorder (!%p347_p3), %s1111_s27, 0 }
   0xd   : > { %s1304_s2 = sld [smem:[#allocation6_spill]] (!%p347_p3) }
   0xe   : > { %s1305_s3 = sld [smem:[#allocation7_spill]] (!%p347_p3) }
   0xf   : > { %s1319_s28 = smov (!%p439_p5, %s1115_s28), 1 }
  0x10   : > { %s449_s12 = scalar_select %p448_p6, %s1111_s27, 3 }
  0x11   : > { %s1031_s13 = sshll.u32 %s1319_s28, 4  ;;  %s993_s14 = sshll.u32 %s1319_s28, 3 }
  0x12   : > { %s446_s17 = scalar_lea.vmem %s1303_s0, %s1031_s13  ;;  %s1032_s18 = sshll.u32 %s449_s12, 4 }
  0x13   : > { %s1215_s21 = scalar_lea.vmem %s1304_s2, %s1032_s18  ;;  %s1225_s11 = scalar_lea.vmem %s1293_s4, %s1032_s18 }
  0x14   : > { %s1220_s24 = scalar_lea.vmem %s1305_s3, %s1032_s18  ;;  %s992_s28 = sshll.u32 %s449_s12, 1 }
  0x15   : > { %s479_s10 = sadd.s32 %s993_s14, %s992_s28  ;;  %515 = sbr.rel (%p1001_p7) target bundleno = 181 (0xb5), region = 48 }
  0x16   : > { %s994_s15 = sshll.u32 %s479_s10, 2 }
  0x17   : > { %s1230_s0 = scalar_lea.vmem %s1295_s6, %s994_s15  ;;  %s1235_s2 = scalar_lea.vmem %s1296_s7, %s994_s15 }
  0x18   : > { %s1240_s3 = scalar_lea.vmem %s1297_s8, %s994_s15 }
  0x1a   : > { %v516_v0 = vld [vmem:[%s446_s17] sm:$0xff]  ;;  %vm520_vm0 = vcmask 261120   ;;  %v517_v2 = vld [vmem:[%s446_s17 + $0x8] sm:$0xff]  ;;  %v1129_v6 = vmov 32.0  }
  0x1b   : > { %v518_v1 = vmul.f32 %v516_v0, %v516_v0  ;;  %v519_v4 = vmul.f32 %v517_v2, %v517_v2  ;;  %1083 = vrcp.f32 %v1129_v6  ;;  %v1082_v27 = vld [vmem:[%s1290_s1] ss:$0 sm:$0xff] }
  0x1d   : > { %v521_v3 = vsel %vm520_vm0, %v518_v1, 0.0  ;;  %v524_v5 = vsel %vm520_vm0, %v519_v4, 0.0 }
  0x1e   : > { %522 = vadd.xlane.f32.xlu0 %v521_v3 }
  0x21   : > { %v1084_v7 = vpop.eup %1083 }
  0x22   : > { %v528_v8 = vmul.f32 32.0, %v1084_v7  ;;  %vm532_vm1 = vweird.f32 %v1084_v7 }
  0x24   : > { %v529_v9 = vsub.f32 1.0, %v528_v8 }
  0x26   : > { %525 = vadd.xlane.f32.xlu0 %v524_v5  ;;  %v530_v10 = vmul.f32 %v1084_v7, %v529_v9 }
  0x28   : > { %v531_v11 = vadd.f32 %v1084_v7, %v530_v10 }
  0x2a   : > { %v533_v12 = vsel %vm532_vm1, %v1084_v7, %v531_v11 }
  0x91   : > { %v523_v13 = vpop.xlane.xlu0 %522 }
  0x92   : > { %v534_v14 = vmul.f32 %v533_v12, %v523_v13 }
  0x94   : > { %v536_v15 = vadd.f32 1e-06, %v534_v14 }
  0x96   : > { %1085 = vrsqrt.f32 %v536_v15  ;;  %vm544_vm3 = vweird.f32 %v536_v15 }
  0x99   : > { %v526_v16 = vpop.xlane.xlu0 %525 }
  0x9a   : > { %v535_v17 = vmul.f32 %v533_v12, %v526_v16 }
  0x9c   : > { %v1086_v18 = vpop.eup %1085  ;;  %v537_v19 = vadd.f32 1e-06, %v535_v17 }
  0x9d   : > { %v539_v20 = vmul.f32 %v1086_v18, %v536_v15  ;;  %vm545_vm2 = vweird.f32 %v1086_v18 }
  0x9e   : > { %1087 = vrsqrt.f32 %v537_v19  ;;  %vm546_vm4 = vmor %vm544_vm3, %vm545_vm2  ;;  %vm554_vm6 = vweird.f32 %v537_v19 }
  0x9f   : > { %v540_v21 = vmul.f32 %v1086_v18, %v539_v20 }
  0xa1   : > { %v541_v22 = vmul.f32 0.5, %v540_v21 }
  0xa3   : > { %v542_v23 = vsub.f32 1.5, %v541_v22 }
  0xa4   : > { %v1088_v24 = vpop.eup %1087 }
  0xa5   : > { %v543_v25 = vmul.f32 %v1086_v18, %v542_v23  ;;  %v549_v26 = vmul.f32 %v1088_v24, %v537_v19  ;;  %vm555_vm5 = vweird.f32 %v1088_v24 }
  0xa6   : > { %vm556_vm7 = vmor %vm554_vm6, %vm555_vm5 }
  0xa7   : > { %v547_v28 = vsel %vm546_vm4, %v1086_v18, %v543_v25  ;;  %v550_v29 = vmul.f32 %v1088_v24, %v549_v26 }
  0xa8   : > { %v558_v30 = vmul.f32 %v547_v28, %v516_v0 }
  0xa9   : > { %v551_v31 = vmul.f32 0.5, %v550_v29 }
  0xaa   : > { %v564_v32 = vmul.f32 %v1082_v27, %v558_v30 }
  0xab   : > { %v552_v33 = vsub.f32 1.5, %v551_v31 }
  0xac   : > { %566 = vst.msk [vmem:[#allocation2] sm:$0xff] %vm520_vm0, %v564_v32 }
  0xad   : > { %v553_v34 = vmul.f32 %v1088_v24, %v552_v33 }
  0xaf   : > { %v557_v35 = vsel %vm556_vm7, %v1088_v24, %v553_v34 }
  0xb0   : > { %v559_v36 = vmul.f32 %v557_v35, %v517_v2 }
  0xb2   : > { %v565_v37 = vmul.f32 %v1082_v27, %v559_v36 }
  0xb4   : > { %567 = vst.msk [vmem:[#allocation2 + $0x8] sm:$0xff] %vm520_vm0, %v565_v37 }
  0xb5 PF: > { %v1036_v38 = vld [vmem:[%s1215_s21 + $0x8] sm:$0xff]  ;;  %v1035_v41 = vld [vmem:[%s1215_s21] sm:$0xff]  ;;  %vm589_vm8 = vcmask 261120   ;;  %vm673_vm9 = vcmask 60416  }
  0xb6   : > { %v1038_v39 = vld [vmem:[%s1220_s24 + $0x8] sm:$0xff]  ;;  %599 = vmatpush.bf16.msra.mxu0 %v1036_v38  ;;  %v1037_v42 = vld [vmem:[%s1220_s24] sm:$0xff] }
  0xb7   : > { %v1040_v40 = vld [vmem:[%s1225_s11 + $0x8] sm:$0xff]  ;;  %629 = vmatpush.bf16.msra.mxu1 %v1038_v39  ;;  %v568_v43 = vld [vmem:[#allocation2] sm:$0xff] }
  0xb8   : > { %659 = vmatpush.bf16.msra.mxu2 %v1040_v40  ;;  %v1039_v45 = vld [vmem:[%s1225_s11] sm:$0xff]  ;;  %v572_v55 = vld [vmem:[%s1294_s5 + $0x8] sm:$0xff] }
  0xb9   : > { %v571_v47 = vld [vmem:[%s1294_s5] sm:$0xff] }
  0xba   : > { %600 = vmatpush.bf16.msra.mxu0 %v1035_v41 }
  0xbb   : > { %v569_v44 = vld [vmem:[#allocation2 + $0x8] sm:$0xff]  ;;  %630 = vmatpush.bf16.msra.mxu1 %v1037_v42 }
  0xbc   : > { %v570_v46 = vpack.c.bf16 %v569_v44, %v568_v43  ;;  %660 = vmatpush.bf16.msra.mxu2 %v1039_v45 }
  0xbe   : > { %1010 = vmatmul.msk.bf16.vlgmr.msra.gmra.mxu0 %vm589_vm8, %v570_v46  ;;  %1019 = vmatmul.msk.bf16.vlgmr.msra.gmra.mxu1 %vm589_vm8, %v570_v46 }
  0xbf   : > { %1028 = vmatmul.msk.bf16.vlgmr.msra.gmra.mxu2 %vm589_vm8, %v570_v46 }
 0x13b   : > { %v602_v48 = vpop.f32.mrf.mxu0  ;;  %v632_v49 = vpop.f32.mrf.mxu1 }
 0x13c   : > { %v667_v50 = vmul.f32 %v602_v48, %v571_v47  ;;  %v676_v51 = vmul.f32 %v632_v49, %v571_v47 }
 0x13e   : > { %v669_v52 = vmul.f32 0.35355338, %v667_v50  ;;  %v678_v53 = vpack.c.bf16 %v676_v51, %v676_v51 }
 0x140   : > { %v671_v54 = vpack.c.bf16 %v669_v52, %v669_v52  ;;  %680 = vst.msk [vmem:[%s1235_s2] sm:$0xf] %vm673_vm9, %v678_v53 }
 0x142   : > { %674 = vst.msk [vmem:[%s1230_s0] sm:$0xf] %vm673_vm9, %v671_v54  ;;  %v662_v56 = vpop.f32.mrf.mxu2 }
 0x143   : > { %v682_v57 = vpack.c.bf16 %v662_v56, %v662_v56  ;;  %v604_v58 = vpop.f32.mrf.mxu0  ;;  %v634_v59 = vpop.f32.mrf.mxu1 }
 0x144   : > { %v668_v60 = vmul.f32 %v604_v58, %v572_v55  ;;  %v677_v61 = vmul.f32 %v634_v59, %v572_v55 }
 0x145   : > { %684 = vst.msk [vmem:[%s1240_s3] sm:$0xf] %vm673_vm9, %v682_v57 }
 0x146   : > { %v670_v62 = vmul.f32 0.35355338, %v668_v60  ;;  %v679_v63 = vpack.c.bf16 %v677_v61, %v677_v61 }
 0x148   : > { %v672_v0 = vpack.c.bf16 %v670_v62, %v670_v62  ;;  %681 = vst.msk [vmem:[%s1235_s2 + $0x4] sm:$0xf] %vm673_vm9, %v679_v63 }
 0x14a   : > { %675 = vst.msk [vmem:[%s1230_s0 + $0x4] sm:$0xf] %vm673_vm9, %v672_v0  ;;  %v664_v1 = vpop.f32.mrf.mxu2 }
 0x14b   : > { %v683_v2 = vpack.c.bf16 %v664_v1, %v664_v1 }
 0x14d   : > { %685 = vst.msk [vmem:[%s1240_s3 + $0x4] sm:$0xf] %vm673_vm9, %v683_v2 }
 0x14e PF: > { %s19_s9 = sadd.s32 1, %s1127_s9   ;;  %s1306_s18 = sld [smem:[#allocation3_spill]] }
 0x14f   : > { %p16_p8 = scmp.ge.s32.totalorder %s19_s9, 10   ;;  %s1307_s21 = sld [smem:[#allocation4_spill]] }
 0x150   : > { %s1308_s27 = smov %s1119_s29  ;;  %s1309_s28 = smov %s1123_s30 }
 0x151   :  { %18 = sbr.rel (!%p16_p8) target bundleno = 4 (0x4), region = 114 }
 0x154   : > { %s1310_s29 = smov %s1306_s18 }
 0x155   : > { %s1311_s30 = smov %s1307_s21 }

// kernel: llama_block_forward.5
= control target key start
LH: loop header
LB: loop body
LE: loop exit
PB: predicated region body
PF: predicated region fallthrough
CT: control target
= control target key end

     0   :  { %s1281_s0 = inlined_call_operand.vmem [shape: f32[32,32], index: 0, kind: input, shape index: {}]   ;;  %s1282_s1 = inlined_call_operand.vmem [shape: f32[32,32], index: 1, kind: input, shape index: {}]   ;;  %s1283_s2 = inlined_call_operand.vmem [shape: f32[1,32], index: 2, kind: input, shape index: {}]   ;;  %s1284_s3 = inlined_call_operand.vmem [shape: bf16[32,64], index: 3, kind: input, shape index: {}]   ;;  %s1285_s4 = inlined_call_operand.vmem [shape: f32[1,64], index: 4, kind: input, shape index: {}]   ;;  %s1286_s5 = inlined_call_operand.vmem [shape: bf16[64,64], index: 5, kind: input, shape index: {}]   ;;  %s1287_s6 = inlined_call_operand.vmem [shape: f32[1,64], index: 6, kind: input, shape index: {}]   ;;  %s1288_s7 = inlined_call_operand.vmem [shape: bf16[64,64], index: 7, kind: input, shape index: {}]   ;;  %s1289_s8 = inlined_call_operand.vmem [shape: f32[1,64], index: 8, kind: input, shape index: {}]   ;;  %s1290_s9 = inlined_call_operand.<no memory space> [shape: f32[1,1], index: 9, kind: input, shape index: {}]   ;;  %s1291_s10 = inlined_call_operand.vmem [shape: bf16[64,32], index: 10, kind: input, shape index: {}]   ;;  %s1292_s11 = inlined_call_operand.vmem [shape: f32[1,32], index: 11, kind: input, shape index: {}]   ;;  %s1293_s12 = inlined_call_operand.hbm [shape: f32[32,32], index: 12, kind: output, shape index: {}]  }
   0x1   :  { %1294 = sst [smem:[#allocation6_spill]] %s1281_s0 }
   0x2   :  { %17 = sst [smem:[#allocation2]] %s1290_s9 }
   0x3   :  { %18 = vsyncpa [#allocation4], 0 }
   0x4   :  { %20 = vsyncpa [#allocation4 + $0x1], 0  ;;  %s1117_s23 = smov 0   ;;  %s1119_s24 = smov 0  }
   0x5   :  { %s1121_s25 = smov 0   ;;  %s1123_s26 = smov 0  }
   0x6 LB: > { %s1138_s9 = sadd.s32 4294967295, %s1044_s26   ;;  %s830_s27 = sadd.s32 4294967294, %s1044_s26   ;;  %s1044_s26 = sphi %s1123_s26, %s1301_s26   ;;  %s1040_s25 = sphi %s1121_s25, %s1300_s25   ;;  %s1036_s24 = sphi %s1119_s24, %s1299_s24   ;;  %s1032_s23 = sphi %s1117_s23, %s1298_s23  }
   0x7   : > { %s1142_s28 = sadd.s32 1, %s1044_s26   ;;  %s295_s29 = sadd.s32 1, %s1040_s25 }
   0x8   : > { %s292_s30 = ssub.s32 %s1044_s26, %s1142_s28  ;;  %p305_p0 = scmp.ne.s32.totalorder %s1040_s25, %s1036_s24 }
   0x9   : > { %p293_p1 = scmp.eq.s32.totalorder %s292_s30, 0  ;;  %p306_p2 = scmp.eq.s32.totalorder %s1138_s9, 1 }
   0xa   : > { %p311_p3 = scmp.ne.s32.totalorder %s1036_s24, %s1032_s23  ;;  %p312_p4 = scmp.eq.s32.totalorder %s830_s27, 1 }
   0xb   : > { %s1153_s13 = scalar_select %p293_p1, %s1040_s25, %s295_s29  }
   0xc   : > { %p1155_p5 = por %p306_p2, %p305_p0  ;;  %p1159_p6 = por %p312_p4, %p311_p3 }
   0xd   : > { %p833_p7 = scmp.ge.s32.totalorder %s1044_s26, 1  ;;  %p378_p8 = scmp.lt.s32.totalorder %s1044_s26, 3 }
   0xf   : > { %p379_p9 = pnand %p833_p7, %p378_p8 }
  0x10   : > { %s835_s16 = sshll.u32 (!%p379_p9), %s1138_s9, 1  ;;  %s1297_s0 = sld [smem:[#allocation6_spill]] (!%p379_p9) }
  0x11   : > { %382 = sbr.rel (%p379_p9) target bundleno = 642 (0x282), region = 68  ;;  %p426_p10 = scmp.lt.s32.totalorder (!%p379_p9), %s835_s16, 3 }
  0x12   : > { %s636_s18 = sld [smem:[#allocation2]] (!%p379_p9)  ;;  %s422_s21 = sand.u32 (!%p379_p9), 1, %s1036_s24  }
  0x13   : > { %s834_s29 = sshll.u32 (!%p379_p9), %s422_s21, 4  ;;  %s920_s30 = sshll.u32 (!%p379_p9), %s1138_s9, 4 }
  0x14   : > { %s752_s19 = scalar_lea.hbm (!%p379_p9), %s1293_s12, %s920_s30  ;;  %s741_s9 = scalar_lea.sflag (!%p379_p9), [#allocation4], %s422_s21 }
  0x16   : > { %s1303_s16 = smov (!%p426_p10, %s835_s16), 3  ;;  %vm447_vm0 = vcmask 261120   ;;  %v1046_v10 = vmov 32.0   ;;  %v907_v16 = vld [vmem:[%s1284_s3 + $0x8] sm:$0xff]  ;;  %v906_v18 = vld [vmem:[%s1284_s3] sm:$0xff]  ;;  %v911_v22 = vld [vmem:[%s1286_s5 + $0x18] sm:$0xff] }
  0x17   : > { %s836_s17 = sshll.u32 %s1303_s16, 3  ;;  %968 = vrcp.f32 %v1046_v10  ;;  %523 = vmatpush.bf16.msra.mxu0 %v907_v16  ;;  %v915_v23 = vld [vmem:[%s1288_s7 + $0x18] sm:$0xff]  ;;  %576 = vmatpush.bf16.msra.mxu1 %v911_v22  ;;  %v963_v41 = vld [vmem:[%s1283_s2] ss:$0 sm:$0xff]  ;;  %v910_v47 = vld [vmem:[%s1286_s5 + $0x10] sm:$0xff]  ;;  %vm568_vm8 = vcmask 523264  }
  0x18   : > { %s429_s20 = scalar_lea.vmem %s1297_s0, %s836_s17  ;;  %s435_s27 = scalar_lea.vmem %s1282_s1, %s836_s17  ;;  %626 = vmatpush.bf16.msra.mxu2 %v915_v23  ;;  %v914_v48 = vld [vmem:[%s1288_s7 + $0x10] sm:$0xff]  ;;  %v909_v49 = vld [vmem:[%s1286_s5 + $0x8] sm:$0xff]  ;;  %v908_v51 = vld [vmem:[%s1286_s5] sm:$0xff]  ;;  %v637_v62 = vstv %s636_s18 }
  0x19   : > { %v439_v0 = vld [vmem:[%s429_s20] sm:$0xff]  ;;  %v440_v2 = vld [vmem:[%s429_s20 + $0x8] sm:$0xff]  ;;  %v919_v60 = vld [vmem:[%s1291_s10 + $0x18] sm:$0xff]  ;;  %s424_s18 = scalar_lea.vmem [#allocation3], %s834_s29  ;;  %s755_s0 = sshll.u32 %s752_s19, 4  ;;  %s756_s0 = int_to_ptr.hbm [resolvable:$true] %s755_s0 }
  0x1a   : > { %v441_v1 = vld [vmem:[%s435_s27] sm:$0xff]  ;;  %v442_v4 = vld [vmem:[%s435_s27 + $0x8] sm:$0xff]  ;;  %726 = vmatpush.bf16.msra.mxu3 %v919_v60  ;;  %s753_s20 = sshll.u32 %s424_s18, 4  ;;  %s996_s22 = sshra.s32 %s756_s0, 4  ;;  %s754_s20 = int_to_ptr.vmem [resolvable:$true] %s753_s20  ;;  %s997_s22 = int_to_ptr.hbm [resolvable:$true] %s996_s22 }
  0x1b   : > { %v1172_v3 = vadd.f32 %v441_v1, %v439_v0  ;;  %v1176_v6 = vadd.f32 %v442_v4, %v440_v2  ;;  %524 = vmatpush.bf16.msra.mxu0 %v906_v18  ;;  %577 = vmatpush.bf16.msra.mxu1 %v910_v47  ;;  %v913_v50 = vld [vmem:[%s1288_s7 + $0x8] sm:$0xff]  ;;  %v912_v52 = vld [vmem:[%s1288_s7] sm:$0xff]  ;;  %v918_v0 = vld [vmem:[%s1291_s10 + $0x10] sm:$0xff]  ;;  %s998_s27 = scalar_lea.hbm %s997_s22, 16  ;;  %s1002_s16 = scalar_lea.hbm %s1293_s12, 32 }
  0x1c   : > { %627 = vmatpush.bf16.msra.mxu2 %v914_v48  ;;  %v964_v54 = vld [vmem:[%s1285_s4] ss:$0 sm:$0xff]  ;;  %v917_v4 = vld [vmem:[%s1291_s10 + $0x8] sm:$0xff]  ;;  %p999_p11 = scmp.ne.s32.totalorder %s997_s22, %s998_s27  ;;  %p1003_p0 = scmp.lt.s32.totalorder %s997_s22, %s1293_s12 }
  0x1d   : > { %v445_v5 = vmul.f32 %v1172_v3, %v1172_v3  ;;  %v446_v8 = vmul.f32 %v1176_v6, %v1176_v6  ;;  %v969_v11 = vpop.eup %968  ;;  %v965_v59 = vld [vmem:[%s1287_s6] ss:$0 sm:$0xff]  ;;  %p1004_p1 = scmp.lt.s32.totalorder %s1002_s16, %s998_s27 }
  0x1e   : > { %v455_v12 = vmul.f32 32.0, %v969_v11  ;;  %vm459_vm1 = vweird.f32 %v969_v11  ;;  %727 = vmatpush.bf16.msra.mxu3 %v918_v0  ;;  %p1000_p12 = pnand %p999_p11, %p1155_p5 }
  0x1f   : > { %v448_v7 = vsel %vm447_vm0, %v445_v5, 0.0  ;;  %v451_v9 = vsel %vm447_vm0, %v446_v8, 0.0  ;;  %578 = vmatpush.bf16.msra.mxu1 %v909_v49  ;;  %v916_v8 = vld [vmem:[%s1291_s10] sm:$0xff]  ;;  %p1005_p2 = por %p1004_p1, %p1003_p0 }
  0x20   : > { %449 = vadd.xlane.f32.xlu0 %v448_v7  ;;  %v456_v13 = vsub.f32 1.0, %v455_v12  ;;  %628 = vmatpush.bf16.msra.mxu2 %v913_v50  ;;  %p1001_p13 = pneg %p1000_p12 }
  0x22   : > { %v457_v14 = vmul.f32 %v969_v11, %v456_v13  ;;  %728 = vmatpush.bf16.msra.mxu3 %v917_v4  ;;  %p1006_p3 = pnand %p1005_p2, %p1001_p13 }
  0x23   : > { %579 = vmatpush.bf16.msra.mxu1 %v908_v51 }
  0x24   : > { %v458_v15 = vadd.f32 %v969_v11, %v457_v14  ;;  %629 = vmatpush.bf16.msra.mxu2 %v912_v52 }
  0x26   : > { %v460_v17 = vsel %vm459_vm1, %v969_v11, %v458_v15  ;;  %729 = vmatpush.bf16.msra.mxu3 %v916_v8 }
  0x28   : > { %452 = vadd.xlane.f32.xlu0 %v451_v9 }
  0x93   : > { %v450_v19 = vpop.xlane.xlu0 %449 }
  0x94   : > { %v461_v20 = vmul.f32 %v460_v17, %v450_v19 }
  0x96   : > { %v463_v21 = vadd.f32 1e-06, %v461_v20 }
  0x98   : > { %970 = vrsqrt.f32 %v463_v21  ;;  %vm471_vm3 = vweird.f32 %v463_v21 }
  0x9b   : > { %v453_v24 = vpop.xlane.xlu0 %452 }
  0x9c   : > { %v462_v25 = vmul.f32 %v460_v17, %v453_v24 }
  0x9e   : > { %v971_v26 = vpop.eup %970  ;;  %v464_v27 = vadd.f32 1e-06, %v462_v25 }
  0x9f   : > { %v466_v28 = vmul.f32 %v971_v26, %v463_v21  ;;  %vm472_vm2 = vweird.f32 %v971_v26 }
  0xa0   : > { %972 = vrsqrt.f32 %v464_v27  ;;  %vm473_vm4 = vmor %vm471_vm3, %vm472_vm2  ;;  %vm481_vm6 = vweird.f32 %v464_v27 }
  0xa1   : > { %v467_v29 = vmul.f32 %v971_v26, %v466_v28 }
  0xa3   : > { %v468_v30 = vmul.f32 0.5, %v467_v29 }
  0xa5   : > { %v469_v31 = vsub.f32 1.5, %v468_v30 }
  0xa6   : > { %v973_v32 = vpop.eup %972 }
  0xa7   : > { %v476_v33 = vmul.f32 %v973_v32, %v464_v27  ;;  %v470_v34 = vmul.f32 %v971_v26, %v469_v31  ;;  %vm482_vm5 = vweird.f32 %v973_v32 }
  0xa8   : > { %vm483_vm7 = vmor %vm481_vm6, %vm482_vm5 }
  0xa9   : > { %v477_v35 = vmul.f32 %v973_v32, %v476_v33  ;;  %v474_v37 = vsel %vm473_vm4, %v971_v26, %v470_v34 }
  0xaa   : > { %v485_v40 = vmul.f32 %v474_v37, %v1172_v3 }
  0xab   : > { %v478_v36 = vmul.f32 0.5, %v477_v35 }
  0xac   : > { %v491_v44 = vmul.f32 %v963_v41, %v485_v40 }
  0xad   : > { %v479_v38 = vsub.f32 1.5, %v478_v36 }
  0xaf   : > { %v480_v39 = vmul.f32 %v973_v32, %v479_v38 }
  0xb1   : > { %v484_v42 = vsel %vm483_vm7, %v973_v32, %v480_v39  ;;  %v966_v32 = vld [vmem:[%s1289_s8] ss:$0 sm:$0xff] }
  0xb2   : > { %v486_v43 = vmul.f32 %v484_v42, %v1176_v6 }
  0xb4   : > { %v492_v45 = vmul.f32 %v963_v41, %v486_v43 }
  0xb6   : > { %v493_v46 = vpack.c.bf16 %v492_v45, %v491_v44  ;;  %v967_v45 = vld [vmem:[%s1292_s11] ss:$0 sm:$0xff] }
  0xb8   : > { %847 = vmatmul.msk.bf16.vlgmr.msra.gmra.mxu0 %vm447_vm0, %v493_v46 }
 0x135   : > { %v526_v53 = vpop.f32.mrf.mxu0 }
 0x136   : > { %v527_v56 = vadd.f32 %v964_v54, %v526_v53 }
 0x13d   : > { %v528_v55 = vpop.f32.mrf.mxu0 }
 0x13e   : > { %v529_v57 = vadd.f32 %v964_v54, %v528_v55 }
 0x140   : > { %v531_v58 = vpack.c.bf16 %v529_v57, %v527_v56 }
 0x142   : > { %864 = vmatmul.msk.bf16.vlgmr.msra.gmra.mxu1 %vm568_vm8, %v531_v58  ;;  %881 = vmatmul.msk.bf16.vlgmr.msra.gmra.mxu2 %vm568_vm8, %v531_v58 }
 0x1bf   : > { %v581_v61 = vpop.f32.mrf.mxu1 }
 0x1c0   : > { %v582_v63 = vadd.f32 %v965_v59, %v581_v61 }
 0x1c2   : > { %v638_v1 = vmul.f32 %v637_v62, %v582_v63 }
 0x1c4   : > { %v882_v2 = vmul.f32 -1.442695, %v638_v1 }
 0x1c5   : > { %v631_v19 = vpop.f32.mrf.mxu2 }
 0x1c6   : > { %974 = vpow2.f32 %v882_v2  ;;  %v632_v39 = vadd.f32 %v966_v32, %v631_v19 }
 0x1c7   : > { %v583_v5 = vpop.f32.mrf.mxu1 }
 0x1c8   : > { %v584_v7 = vadd.f32 %v965_v59, %v583_v5 }
 0x1ca   : > { %v639_v9 = vmul.f32 %v637_v62, %v584_v7 }
 0x1cc   : > { %v975_v10 = vpop.eup %974  ;;  %v883_v11 = vmul.f32 -1.442695, %v639_v9 }
 0x1cd   : > { %v646_v12 = vadd.f32 1.0, %v975_v10  ;;  %v633_v35 = vpop.f32.mrf.mxu2 }
 0x1ce   : > { %976 = vpow2.f32 %v883_v11  ;;  %v634_v41 = vadd.f32 %v966_v32, %v633_v35 }
 0x1cf   : > { %978 = vrcp.f32 %v646_v12  ;;  %v659_v22 = vand.u32 2147483648, %v646_v12  ;;  %vm653_vm10 = vweird.f32 %v646_v12  ;;  %v657_v23 = vand.u32 2147483647, %v646_v12 }
 0x1d1   : > { %v660_v27 = vor.u32 1.1754944e-38, %v659_v22  ;;  %vm658_vm12 = vcmp.eq.f32.partialorder %v657_v23, 8.507059e+37 }
 0x1d4   : > { %v977_v13 = vpop.eup %976 }
 0x1d5   : > { %v979_v14 = vpop.eup %978  ;;  %v647_v15 = vadd.f32 1.0, %v977_v13 }
 0x1d6   : > { %v649_v16 = vmul.f32 %v979_v14, %v646_v12  ;;  %vm654_vm9 = vweird.f32 %v979_v14 }
 0x1d7   : > { %980 = vrcp.f32 %v647_v15  ;;  %vm655_vm11 = vmor %vm653_vm10, %vm654_vm9  ;;  %v674_v28 = vand.u32 2147483648, %v647_v15  ;;  %v672_v30 = vand.u32 2147483647, %v647_v15  ;;  %vm668_vm14 = vweird.f32 %v647_v15 }
 0x1d8   : > { %v650_v17 = vsub.f32 1.0, %v649_v16 }
 0x1d9   : > { %v675_v34 = vor.u32 1.1754944e-38, %v674_v28  ;;  %vm673_vm1 = vcmp.eq.f32.partialorder %v672_v30, 8.507059e+37 }
 0x1da   : > { %v651_v18 = vmul.f32 %v979_v14, %v650_v17 }
 0x1dc   : > { %v652_v20 = vadd.f32 %v979_v14, %v651_v18 }
 0x1dd   : > { %v981_v21 = vpop.eup %980 }
 0x1de   : > { %v664_v24 = vmul.f32 %v981_v21, %v647_v15  ;;  %v656_v25 = vsel %vm655_vm11, %v979_v14, %v652_v20  ;;  %vm669_vm13 = vweird.f32 %v981_v21 }
 0x1df   : > { %v661_v31 = vsel %vm658_vm12, %v660_v27, %v656_v25  ;;  %vm670_vm15 = vmor %vm668_vm14, %vm669_vm13 }
 0x1e0   : > { %v665_v26 = vsub.f32 1.0, %v664_v24  ;;  %v678_v36 = vmul.f32 %v661_v31, %v582_v63 }
 0x1e2   : > { %v666_v29 = vmul.f32 %v981_v21, %v665_v26  ;;  %v680_v42 = vmul.f32 %v678_v36, %v632_v39 }
 0x1e4   : > { %v667_v33 = vadd.f32 %v981_v21, %v666_v29 }
 0x1e6   : > { %v671_v37 = vsel %vm670_vm15, %v981_v21, %v667_v33 }
 0x1e7   : > { %v676_v38 = vsel %vm673_vm1, %v675_v34, %v671_v37 }
 0x1e8   : > { %v679_v40 = vmul.f32 %v676_v38, %v584_v7 }
 0x1ea   : > { %v681_v43 = vmul.f32 %v679_v40, %v634_v41 }
 0x1ec   : > { %v682_v44 = vpack.c.bf16 %v681_v43, %v680_v42 }
 0x1ee   : > { %900 = vmatmul.msk.bf16.vlgmr.msra.gmra.mxu3 %vm568_vm8, %v682_v44 }
 0x271   : > { %v731_v46 = vpop.f32.mrf.mxu3 }
 0x272   : > { %v732_v47 = vadd.f32 %v967_v45, %v731_v46 }
 0x274   : > { %v736_v48 = vadd.f32 %v732_v47, %v1172_v3 }
 0x276   : > { %738 = vst.msk [vmem:[%s424_s18] sm:$0xff] %vm447_vm0, %v736_v48 }
 0x279   : > { %v733_v49 = vpop.f32.mrf.mxu3 }
 0x27a   : > { %v734_v50 = vadd.f32 %v967_v45, %v733_v49 }
 0x27c   : > { %v737_v51 = vadd.f32 %v734_v50, %v1176_v6 }
 0x27e   : > { %739 = vst.msk [vmem:[%s424_s18 + $0x8] sm:$0xff] %vm447_vm0, %v737_v51 }
 0x27f   : > { %1009 = shalt.err (!%p1006_p3)
}
 0x280   : > { %s1047_s21 = smov 128   ;;  %s1048_s18 = smov 8  }
 0x281   : > { %921 = dma.vmem_to_hbm [thread:$0]  (%p1155_p5), %s754_s20, 256, %s756_s0, %s741_s9, %s1047_s21, %s1047_s21, %s1048_s18  }
 0x282 PF: > { %p927_p4 = scmp.ge.s32.totalorder %s1044_s26, 2  ;;  %s770_s29 = sand.u32 1, %s1032_s23  }
 0x283   : > { %s771_s30 = scalar_lea.sflag [#allocation4], %s770_s29 }
 0x284   : > { %p924_p7 = pnand %p927_p4, %p1159_p6 }
 0x286   : > { %p925_p8 = pneg %p924_p7 }
 0x288   : > { %1027 = dma.done.wait (%p925_p8), %s771_s30, 256  }
 0x289   : > { %1029 = vsyncadd (%p925_p8), %s771_s30, 4294967040  ;;  %p23_p9 = scmp.ge.s32.totalorder %s1142_s28, 4   ;;  %s1298_s23 = smov %s1036_s24 }
 0x28a   : > { %s1299_s24 = smov %s1040_s25  ;;  %s1300_s25 = smov %s1153_s13 }
 0x28b   : > { %s1301_s26 = smov %s1142_s28  ;;  %25 = sbr.rel (!%p23_p9) target bundleno = 6 (0x6), region = 106 }
 0x290   :  { %777 = vsyncpa [#allocation4], 1 }
 0x291   :  { %779 = vsyncpa [#allocation4 + $0x1], 1 }

</bundles_post_ra>
